<compile_context>
chip_gen: v7x
topology: tpu7x:2x2x1
jax: 0.10.0
libtpu: 0.0.40
codegen_flags: <defaults>
</compile_context>

<pallas_src>
import functools

import jax
import jax.numpy as jnp
from jax import lax
from jax.experimental import pallas as pl
from jax.experimental.pallas import tpu as pltpu

_LANE = 128
_MAX_TILE_ROWS = 8192


def _round_up(n, m):
    return ((n + m - 1) // m) * m


def _vmem_config():
    """Generation-aware VMEM sizing.

    Returns (data_budget_bytes, vmem_limit_bytes, assume_dual_core)."""
    vmem = None
    try:
        info = pltpu.get_tpu_info()
        vmem = int(getattr(info, "vmem_capacity_bytes"))
    except Exception:
        vmem = None
    if vmem is not None and vmem >= 96 * 1024 * 1024:
        # v5e / v6e: 128 MiB physical VMEM, single TensorCore per chip.
        return 64 * 1024 * 1024, 96 * 1024 * 1024, False
    # v7x (64 MiB per TC, 2 TCs per chip) or unknown: conservative budget,
    # dual-core-friendly step count.
    return 20 * 1024 * 1024, 36 * 1024 * 1024, True


def _layer_norm_kernel(x_ref, gamma_ref, beta_ref, o_ref, *, eps, hidden, hidden_padded):
    # x_ref: (TILE_ROWS, H_pad), gamma_ref/beta_ref: (1, H_pad) f32, o_ref: (TILE_ROWS, H_pad)
    x = x_ref[...]
    if x.dtype != jnp.float32:
        x = x.astype(jnp.float32)
    inv_h = 1.0 / float(hidden)

    # Pass 1: mean. Padded columns (if any) are zero, so sum(x) is already correct.
    mu = jnp.sum(x, axis=-1, keepdims=True) * inv_h
    d = x - mu

    # Pass 2: variance as mean((x - mu)^2) — matches apex ln_fwd numerics.
    if hidden_padded != hidden:
        col = lax.broadcasted_iota(jnp.int32, x.shape, dimension=x.ndim - 1)
        dsq = jnp.where(col < hidden, d * d, 0.0)
    else:
        dsq = d * d
    var = jnp.sum(dsq, axis=-1, keepdims=True) * inv_h
    rsigma = lax.rsqrt(var + eps)

    # gamma/beta are pre-cast to f32 by the wrapper (padded columns carry 0s).
    y = d * rsigma * gamma_ref[...] + beta_ref[...]
    o_ref[...] = y.astype(o_ref.dtype)


def _choose_tile_rows(rows, hidden_padded, in_dtype, out_dtype, data_budget, dual_core):
    in_bytes = jnp.dtype(in_dtype).itemsize
    out_bytes = jnp.dtype(out_dtype).itemsize
    # sublane packing: 8 rows for 32-bit, 16 for 16-bit, 32 for 8-bit dtypes
    packing = max(32 // in_bytes, 32 // out_bytes, 8)

    # Per-element VMEM footprint: double-buffered input + double-buffered output
    # + fp32 temporaries (f32 in/out needs no upcast copy -> +4, else +8).
    temp_bytes = 4 if (in_bytes == 4 and out_bytes == 4) else 8
    bytes_per_elem = 2 * in_bytes + 2 * out_bytes + temp_bytes
    row_bytes = hidden_padded * bytes_per_elem

    if packing * row_bytes > data_budget:
        # TODO(synk): add a column-blocked two-pass path for very wide hidden sizes.
        raise NotImplementedError(
            f"hidden={hidden_padded} too wide for a single row-group tile "
            f"({packing * row_bytes} bytes > budget {data_budget} bytes)")

    tile_rows = max(packing, data_budget // row_bytes)
    tile_rows = min(tile_rows, _MAX_TILE_ROWS, _round_up(rows, packing))
    tile_rows = max(packing, (tile_rows // packing) * packing)

    if dual_core and rows > packing:
        # Force an even number (>=2) of grid steps so the "parallel" axis splits
        # evenly across the two TensorCores on v7x.
        steps = pl.cdiv(rows, tile_rows)
        if steps % 2 == 1:
            steps += 1
            tile_rows = max(packing, _round_up(pl.cdiv(rows, steps), packing))
    return tile_rows


def fast_layer_norm(x, weight, bias, eps=1e-5, *, tile_rows=None):
    """Forward pass of apex FastLayerNorm using a Pallas TPU kernel."""
    hidden = weight.shape[-1]
    assert bias.shape[-1] == hidden, "bias must match hidden_size"
    assert x.shape[-1] == hidden, "last dim of x must equal hidden_size"

    orig_shape = x.shape
    xmat = x.reshape(-1, hidden)
    rows = xmat.shape[0]

    # Keep output stores lane-dense: pad hidden up to a multiple of 128.
    hidden_padded = _round_up(hidden, _LANE)
    gamma = weight.astype(jnp.float32).reshape(1, hidden)
    beta = bias.astype(jnp.float32).reshape(1, hidden)
    if hidden_padded != hidden:
        pad = hidden_padded - hidden
        xmat = jnp.pad(xmat, ((0, 0), (0, pad)))
        gamma = jnp.pad(gamma, ((0, 0), (0, pad)))
        beta = jnp.pad(beta, ((0, 0), (0, pad)))

    data_budget, vmem_limit, dual_core = _vmem_config()
    if tile_rows is None:
        tile_rows = _choose_tile_rows(rows, hidden_padded, x.dtype, x.dtype,
                                      data_budget, dual_core)

    # No host-side row padding: Pallas handles the ragged last block (rows are
    # normalized independently, so padded-read garbage never affects valid rows).
    grid = (pl.cdiv(rows, tile_rows),)

    itemsize = jnp.dtype(x.dtype).itemsize
    cost = pl.CostEstimate(
        flops=7 * rows * hidden,
        transcendentals=rows,
        bytes_accessed=rows * hidden_padded * 2 * itemsize + 2 * hidden_padded * 4,
    )

    out = pl.pallas_call(
        functools.partial(_layer_norm_kernel, eps=float(eps),
                          hidden=hidden, hidden_padded=hidden_padded),
        out_shape=jax.ShapeDtypeStruct((rows, hidden_padded), x.dtype),
        grid_spec=pltpu.PrefetchScalarGridSpec(
            num_scalar_prefetch=0,
            grid=grid,
            in_specs=[
                pl.BlockSpec((tile_rows, hidden_padded), lambda i: (i, 0)),
                pl.BlockSpec((1, hidden_padded), lambda i: (0, 0)),
                pl.BlockSpec((1, hidden_padded), lambda i: (0, 0)),
            ],
            out_specs=pl.BlockSpec((tile_rows, hidden_padded), lambda i: (i, 0)),
        ),
        compiler_params=pltpu.CompilerParams(
            dimension_semantics=("parallel",),
            vmem_limit_bytes=vmem_limit,
        ),
        cost_estimate=cost,
    )(xmat, gamma, beta)

    if hidden_padded != hidden:
        out = out[:, :hidden]
    return out.reshape(orig_shape)


class FastLayerNorm:
    """Minimal JAX mirror of apex.contrib.layer_norm.FastLayerNorm (forward only)."""

    def __init__(self, hidden_size, eps=1e-5, memory_efficient=False):
        self.epsilon = eps
        self.memory_efficient = memory_efficient  # only affects backward in apex
        # reset_parameters: weight=ones, bias=zeros
        self.weight = jnp.ones((hidden_size,), dtype=jnp.float32)
        self.bias = jnp.zeros((hidden_size,), dtype=jnp.float32)

    def __call__(self, x):
        # TODO(synk): backward (ln_bwd) and autocast handling not implemented (forward only).
        return fast_layer_norm(x, self.weight, self.bias, self.epsilon)


def _reference(x, w, b, eps):
    mu = jnp.mean(x, axis=-1, keepdims=True)
    var = jnp.mean((x - mu) ** 2, axis=-1, keepdims=True)
    return (x - mu) * lax.rsqrt(var + eps) * w + b


if __name__ == "__main__":
    batch, seq, hidden = 2, 8, 128
    key = jax.random.PRNGKey(0)
    x = jax.random.normal(key, (batch, seq, hidden), dtype=jnp.float32)

    ln = FastLayerNorm(hidden, eps=1e-5)
    # Non-trivial but deterministic gamma/beta so the affine path is exercised.
    kg, kb = jax.random.split(jax.random.PRNGKey(1))
    ln.weight = 1.0 + 0.1 * jax.random.normal(kg, (hidden,), dtype=jnp.float32)
    ln.bias = 0.1 * jax.random.normal(kb, (hidden,), dtype=jnp.float32)

    y = ln(x)
    jax.block_until_ready(y)
    y_ref = _reference(x, ln.weight, ln.bias, 1e-5)
    assert y.shape == x.shape
    assert jnp.allclose(y, y_ref, atol=1e-5, rtol=1e-5)

    # Ragged-edge path: rows (24) not a multiple of tile_rows (16) -> last block masked.
    x2 = jax.random.normal(jax.random.PRNGKey(2), (3, 8, hidden), dtype=jnp.float32)
    y2 = fast_layer_norm(x2, ln.weight, ln.bias, 1e-5, tile_rows=16)
    jax.block_until_ready(y2)
    y2_ref = _reference(x2, ln.weight, ln.bias, 1e-5)
    assert jnp.allclose(y2, y2_ref, atol=1e-5, rtol=1e-5)

    # Non-multiple-of-128 hidden path: zero-padded to lane-dense width in the wrapper.
    hidden3 = 96
    w3 = 1.0 + 0.1 * jax.random.normal(jax.random.PRNGKey(3), (hidden3,), dtype=jnp.float32)
    b3 = 0.1 * jax.random.normal(jax.random.PRNGKey(4), (hidden3,), dtype=jnp.float32)
    x3 = jax.random.normal(jax.random.PRNGKey(5), (2, 8, hidden3), dtype=jnp.float32)
    y3 = fast_layer_norm(x3, w3, b3, 1e-5)
    jax.block_until_ready(y3)
    y3_ref = _reference(x3, w3, b3, 1e-5)
    assert y3.shape == x3.shape
    assert jnp.allclose(y3, y3_ref, atol=1e-5, rtol=1e-5)

    print("KERNEL_OK")
</pallas_src>

<mosaic_0001>
module attributes {stable_mosaic.version = 11 : i64} {
  func.func @_layer_norm_kernel(%arg0: i32, %arg1: memref<8x128xf32, #tpu.memory_space<vmem>>, %arg2: memref<1x128xf32, #tpu.memory_space<vmem>>, %arg3: memref<1x128xf32, #tpu.memory_space<vmem>>, %arg4: memref<8x128xf32, #tpu.memory_space<vmem>>) attributes {dimension_semantics = [#tpu.dimension_semantics<parallel>], iteration_bounds = array<i64: 2>, scalar_prefetch = 0 : i64, scratch_operands = 0 : i64, tpu.core_type = #tpu.core_type<tc>, window_params = [{transform_indices = @transform_0, window_bounds = array<i64: 8, 128>}, {pipeline_mode = #tpu.pipeline_mode<synchronous>, transform_indices = @transform_1, window_bounds = array<i64: 1, 128>}, {pipeline_mode = #tpu.pipeline_mode<synchronous>, transform_indices = @transform_2, window_bounds = array<i64: 1, 128>}, {transform_indices = @transform_3, window_bounds = array<i64: 8, 128>}]} {
    %c0 = arith.constant 0 : index
    %c0_0 = arith.constant 0 : index
    %0 = vector.load %arg1[%c0, %c0_0] : memref<8x128xf32, #tpu.memory_space<vmem>>, vector<8x128xf32>
    %cst = arith.constant dense<0.000000e+00> : vector<8xf32>
    %1 = vector.multi_reduction <add>, %0, %cst [1] : vector<8x128xf32> to vector<8xf32>
    %2 = vector.shape_cast %1 : vector<8xf32> to vector<8x1xf32>
    %cst_1 = arith.constant 7.812500e-03 : f32
    %3 = vector.broadcast %cst_1 : f32 to vector<8x1xf32>
    %4 = arith.mulf %2, %3 : vector<8x1xf32>
    %5 = vector.broadcast %4 : vector<8x1xf32> to vector<8x128xf32>
    %6 = arith.subf %0, %5 : vector<8x128xf32>
    %7 = arith.mulf %6, %6 : vector<8x128xf32>
    %cst_2 = arith.constant dense<0.000000e+00> : vector<8xf32>
    %8 = vector.multi_reduction <add>, %7, %cst_2 [1] : vector<8x128xf32> to vector<8xf32>
    %9 = vector.shape_cast %8 : vector<8xf32> to vector<8x1xf32>
    %cst_3 = arith.constant 7.812500e-03 : f32
    %10 = vector.broadcast %cst_3 : f32 to vector<8x1xf32>
    %11 = arith.mulf %9, %10 : vector<8x1xf32>
    %cst_4 = arith.constant 9.99999974E-6 : f32
    %12 = vector.broadcast %cst_4 : f32 to vector<8x1xf32>
    %13 = arith.addf %11, %12 : vector<8x1xf32>
    %14 = math.rsqrt %13 : vector<8x1xf32>
    %15 = vector.broadcast %14 : vector<8x1xf32> to vector<8x128xf32>
    %16 = arith.mulf %6, %15 : vector<8x128xf32>
    %c0_5 = arith.constant 0 : index
    %c0_6 = arith.constant 0 : index
    %17 = vector.load %arg2[%c0_5, %c0_6] : memref<1x128xf32, #tpu.memory_space<vmem>>, vector<1x128xf32>
    %18 = vector.broadcast %17 : vector<1x128xf32> to vector<8x128xf32>
    %19 = arith.mulf %16, %18 : vector<8x128xf32>
    %c0_7 = arith.constant 0 : index
    %c0_8 = arith.constant 0 : index
    %20 = vector.load %arg3[%c0_7, %c0_8] : memref<1x128xf32, #tpu.memory_space<vmem>>, vector<1x128xf32>
    %21 = vector.broadcast %20 : vector<1x128xf32> to vector<8x128xf32>
    %22 = arith.addf %19, %21 : vector<8x128xf32>
    %c0_9 = arith.constant 0 : index
    %c0_10 = arith.constant 0 : index
    %23 = vector.load %arg4[%c0_9, %c0_10] : memref<8x128xf32, #tpu.memory_space<vmem>>, vector<8x128xf32>
    tpu.vector_store %arg4[%c0_9, %c0_10], %22 {strides = array<i32>} : memref<8x128xf32, #tpu.memory_space<vmem>>, vector<8x128xf32>,
    return
  }
  func.func @transform_0(%arg0: i32) -> (i32, i32) {
    %c0_i32 = arith.constant 0 : i32
    %c0_i32_0 = arith.constant 0 : i32
    return %arg0, %c0_i32 : i32, i32
  }
  func.func @transform_1(%arg0: i32) -> (i32, i32) {
    %c0_i32 = arith.constant 0 : i32
    %c0_i32_0 = arith.constant 0 : i32
    %c0_i32_1 = arith.constant 0 : i32
    return %c0_i32, %c0_i32_0 : i32, i32
  }
  func.func @transform_2(%arg0: i32) -> (i32, i32) {
    %c0_i32 = arith.constant 0 : i32
    %c0_i32_0 = arith.constant 0 : i32
    %c0_i32_1 = arith.constant 0 : i32
    return %c0_i32, %c0_i32_0 : i32, i32
  }
  func.func @transform_3(%arg0: i32) -> (i32, i32) {
    %c0_i32 = arith.constant 0 : i32
    %c0_i32_0 = arith.constant 0 : i32
    return %arg0, %c0_i32 : i32, i32
  }
}

</mosaic_0001>

<bundles_post_ra>
// kernel: tpu_custom_call.1
= control target key start
LH: loop header
LB: loop body
LE: loop exit
PB: predicated region body
PF: predicated region fallthrough
CT: control target
= control target key end

     0   :  { %8 = vsyncpa [#allocation3], 0  ;;  %s648_s0 = inlined_call_operand.hbm [shape: f32[16,128], index: 0, kind: input, shape index: {}]   ;;  %s649_s1 = inlined_call_operand.vmem [shape: f32[1,128], index: 1, kind: input, shape index: {}]   ;;  %s650_s2 = inlined_call_operand.vmem [shape: f32[1,128], index: 2, kind: input, shape index: {}]   ;;  %s651_s3 = inlined_call_operand.hbm [shape: f32[16,128], index: 3, kind: output, shape index: {}]  }
   0x1   :  { %10 = vsyncpa [#allocation3 + $0x1], 0 }
   0x2   :  { %11 = vsyncpa [#allocation4], 0 }
   0x3   :  { %13 = vsyncpa [#allocation4 + $0x1], 0  ;;  %s481_s12 = smov 0   ;;  %s483_s13 = smov 0  }
   0x4   :  { %s485_s14 = smov 0   ;;  %s487_s15 = smov 0  }
   0x5 LB: > { %s502_s16 = sadd.s32 4294967295, %s457_s15   ;;  %s299_s17 = sadd.s32 4294967294, %s457_s15   ;;  %s457_s15 = sphi %s487_s15, %s666_s15   ;;  %s453_s14 = sphi %s485_s14, %s665_s14   ;;  %s449_s13 = sphi %s483_s13, %s664_s13   ;;  %s445_s12 = sphi %s481_s12, %s663_s12  }
   0x6   : > { %s506_s18 = sadd.s32 1, %s457_s15   ;;  %s26_s19 = sadd.s32 1, %s453_s14 }
   0x7   : > { %s23_s20 = ssub.s32 %s457_s15, %s506_s18  ;;  %p33_p0 = scmp.ne.s32.totalorder %s453_s14, %s449_s13 }
   0x8   : > { %p24_p1 = scmp.eq.s32.totalorder %s23_s20, 0  ;;  %p34_p2 = scmp.eq.s32.totalorder %s457_s15, 0 }
   0x9   : > { %p39_p3 = scmp.ne.s32.totalorder %s449_s13, %s445_s12  ;;  %p40_p4 = scmp.eq.s32.totalorder %s502_s16, 0 }
   0xa   : > { %s518_s21 = scalar_select %p24_p1, %s453_s14, %s26_s19  }
   0xb   : > { %p520_p5 = por %p34_p2, %p33_p0  ;;  %p524_p6 = por %p40_p4, %p39_p3 }
   0xc   : > { %p105_p7 = scmp.eq.s32.totalorder %s502_s16, 1  ;;  %p111_p8 = scmp.eq.s32.totalorder %s299_s17, 1 }
   0xd   : > { %p325_p10 = scmp.lt.s32.totalorder %s457_s15, 2  ;;  %s137_s26 = sand.u32 1, %s453_s14  }
   0xe   : > { %p531_p11 = por %p105_p7, %p33_p0  ;;  %p535_p12 = por %p111_p8, %p39_p3 }
   0xf   : > { %s303_s27 = sshll.u32 %s457_s15, 7  ;;  %s302_s28 = sshll.u32 %s137_s26, 3 }
  0x10   : > { %s655_s24 = scalar_select %p531_p11, 1, 0 }
  0x11   : > { %s656_s25 = scalar_select %p535_p12, 1, 0 }
  0x12   : > { %s544_s4 = scalar_lea.hbm %s648_s0, %s303_s27  ;;  %s141_s5 = scalar_lea.vmem [#allocation2], %s302_s28 }
  0x13   : > { %s148_s6 = sshll.u32 %s141_s5, 4  ;;  %p548_p13 = pnand %p325_p10, %p520_p5  ;;  %s552_s6 = int_to_ptr.vmem [resolvable:$true] %s148_s6 }
  0x14   : > { %s138_s8 = scalar_lea.sflag [#allocation3], %s137_s26  ;;  %s361_s9 = scalar_lea.hbm %s544_s4, 128 }
  0x15   : > { %p362_p2 = scmp.ne.s32.totalorder %s544_s4, %s361_s9  ;;  %p363_p3 = pneg %p548_p13 }
  0x16   : > { %s366_s17 = scalar_lea.hbm %s648_s0, 256  ;;  %p367_p5 = scmp.lt.u32.totalorder %s544_s4, %s648_s0 }
  0x17   : > { %p364_p4 = pnand %p363_p3, %p362_p2  ;;  %p368_p8 = scmp.lt.u32.totalorder %s366_s17, %s361_s9 }
  0x18   : > { %p370_p9 = scmp.lt.u32.totalorder %s361_s9, %s544_s4 }
  0x19   : > { %p365_p7 = pneg %p364_p4  ;;  %p369_p10 = por %p368_p8, %p367_p5 }
  0x1b   : > { %p371_p0 = por %p370_p9, %p369_p10 }
  0x1d   : > { %p372_p1 = pnand %p371_p0, %p365_p7 }
  0x1f   : > { %375 = shalt.err (!%p372_p1)
}
  0x20   : > { %s376_s22 = scalar_lea.vmem %s552_s6, 128  ;;  %s459_s26 = smov [#allocation2]  }
  0x21   : > { %p377_p2 = scmp.ne.s32.totalorder %s552_s6, %s376_s22  ;;  %s381_s27 = sshll.u32 %s459_s26, 4  ;;  %s382_s27 = int_to_ptr.vmem [resolvable:$false] %s381_s27 }
  0x22   : > { %s383_s28 = scalar_lea.vmem %s382_s27, 256  ;;  %p384_p11 = scmp.lt.s32.totalorder %s552_s6, %s382_s27 }
  0x23   : > { %p379_p4 = pnand %p377_p2, %p363_p3  ;;  %p385_p5 = scmp.lt.s32.totalorder %s383_s28, %s376_s22 }
  0x25   : > { %p380_p12 = pneg %p379_p4  ;;  %p386_p8 = por %p385_p5, %p384_p11 }
  0x27   : > { %p387_p9 = pnand %p386_p8, %p380_p12 }
  0x29   : > { %390 = shalt.err (!%p387_p9)
}
  0x2a   : > { %320 = dma.hbm_to_vmem [thread:$0]  (!%p548_p13), %s544_s4, 128, %s552_s6, %s138_s8  }
  0x2b   : > { %p658_p0 = scmp.lt.s32.totalorder %s457_s15, 3  ;;  %p659_p1 = scmp.ge.s32.totalorder %s457_s15, 1 }
  0x2d   : > { %p154_p3 = pnand %p659_p1, %p658_p0 }
  0x2e   : > { %s586_s29 = sand.u32 (!%p154_p3), 1, %s449_s13  }
  0x2f   : > { %157 = sbr.rel (%p154_p3) target bundleno = 381 (0x17d), region = 32  ;;  %s305_s30 = sshll.u32 (!%p154_p3), %s586_s29, 3 }
  0x30   : > { %s160_s5 = scalar_lea.sflag (!%p154_p3), [#allocation3], %s586_s29  ;;  %s163_s9 = scalar_lea.vmem (!%p154_p3), [#allocation2], %s305_s30 }
  0x36   : > { %436 = dma.done.wait (%p524_p6), %s160_s5, 128  }
  0x37   : > { %438 = vsyncadd (%p524_p6), %s160_s5, 4294967168  ;;  %v186_v0 = vld [vmem:[%s163_s9] sm:$0xff]  ;;  %s310_s8 = sshll.u32 %s502_s16, 7  ;;  %s185_s10 = scalar_lea.vmem [#allocation5], %s305_s30 }
  0x38   : > { %187 = vadd.xlane.f32.xlu0 %v186_v0  ;;  %v307_v9 = vld [vmem:[%s649_s1] ss:$0 sm:$0xff]  ;;  %s229_s11 = sshll.u32 %s185_s10, 4  ;;  %s604_s20 = scalar_lea.hbm %s651_s3, %s310_s8  ;;  %s606_s11 = int_to_ptr.vmem [resolvable:$true] %s229_s11 }
  0x39   : > { %v308_v11 = vld [vmem:[%s650_s2] ss:$0 sm:$0xff]  ;;  %s216_s22 = scalar_lea.sflag [#allocation4], %s586_s29  ;;  %s391_s26 = scalar_lea.vmem %s606_s11, 128 }
  0x3a   : > { %p392_p6 = scmp.ne.s32.totalorder %s606_s11, %s391_s26  ;;  %p660_p11 = scmp.ne.s32.totalorder %s655_s24, 0 }
  0x3b   : > { %s460_s16 = smov [#allocation5]  }
  0x3c   : > { %p393_p12 = pnand %p392_p6, %p660_p11  ;;  %s395_s27 = sshll.u32 %s460_s16, 4  ;;  %s396_s27 = int_to_ptr.vmem [resolvable:$false] %s395_s27 }
  0x3d   : > { %s397_s28 = scalar_lea.vmem %s396_s27, 256  ;;  %p398_p7 = scmp.lt.s32.totalorder %s606_s11, %s396_s27 }
  0x3e   : > { %p394_p13 = pneg %p393_p12  ;;  %p399_p10 = scmp.lt.s32.totalorder %s397_s28, %s391_s26 }
  0x40   : > { %p400_p2 = por %p399_p10, %p398_p7 }
  0x42   : > { %p401_p4 = pnand %p400_p2, %p394_p13 }
  0xc5   : > { %v188_v1 = vpop.xlane.xlu0 %187 }
  0xc6   : > { %v189_v2 = vmul.f32 0.0078125, %v188_v1 }
  0xc8   : > { %v190_v3 = vsub.f32 %v186_v0, %v189_v2 }
  0xca   : > { %v191_v4 = vmul.f32 %v190_v3, %v190_v3 }
  0xcc   : > { %192 = vadd.xlane.f32.xlu0 %v191_v4 }
 0x159   : > { %v193_v5 = vpop.xlane.xlu0 %192 }
 0x15a   : > { %v194_v6 = vmul.f32 0.0078125, %v193_v5 }
 0x15c   : > { %v195_v7 = vadd.f32 1e-05, %v194_v6 }
 0x15e   : > { %359 = vrsqrt.f32 %v195_v7 }
 0x168   : > { %v360_v8 = vpop.eup %359 }
 0x169   : > { %v197_v10 = vmul.f32 %v360_v8, %v190_v3 }
 0x16b   : > { %v205_v12 = vmul.f32 %v307_v9, %v197_v10 }
 0x16d   : > { %v213_v13 = vadd.f32 %v308_v11, %v205_v12 }
 0x16f   : > { %214 = vst [vmem:[%s185_s10] sm:$0xff] %v213_v13 }
 0x170   : > { %404 = shalt.err (!%p401_p4)
}
 0x171   : > { %s405_s29 = scalar_lea.hbm %s604_s20, 128  ;;  %s409_s9 = scalar_lea.hbm %s651_s3, 256 }
 0x172   : > { %p406_p5 = scmp.ne.s32.totalorder %s604_s20, %s405_s29  ;;  %p410_p0 = scmp.lt.u32.totalorder %s604_s20, %s651_s3 }
 0x173   : > { %p411_p1 = scmp.lt.u32.totalorder %s409_s9, %s405_s29  ;;  %p413_p6 = scmp.lt.u32.totalorder %s405_s29, %s604_s20 }
 0x174   : > { %p407_p8 = pnand %p406_p5, %p660_p11 }
 0x175   : > { %p412_p3 = por %p411_p1, %p410_p0 }
 0x176   : > { %p408_p9 = pneg %p407_p8 }
 0x177   : > { %p414_p12 = por %p413_p6, %p412_p3 }
 0x179   : > { %p415_p13 = pnand %p414_p12, %p408_p9 }
 0x17b   : > { %418 = shalt.err (!%p415_p13)
}
 0x17c   : > { %315 = dma.vmem_to_hbm [thread:$0]  (%p660_p11), %s606_s11, 128, %s604_s20, %s216_s22  }
 0x17d PF: > { %s241_s23 = sand.u32 1, %s445_s12   ;;  %p661_p7 = scmp.ne.s32.totalorder %s656_s25, 0 }
 0x17e   : > { %p662_p10 = scmp.ge.s32.totalorder %s457_s15, 2  ;;  %s242_s7 = scalar_lea.sflag [#allocation4], %s241_s23 }
 0x180   : > { %p322_p2 = pnand %p662_p10, %p661_p7 }
 0x182   : > { %440 = dma.done.wait (!%p322_p2), %s242_s7, 128  }
 0x183   : > { %442 = vsyncadd (!%p322_p2), %s242_s7, 4294967168  ;;  %p16_p4 = scmp.ge.s32.totalorder %s506_s18, 4   ;;  %s663_s12 = smov %s449_s13 }
 0x184   : > { %s664_s13 = smov %s453_s14  ;;  %s665_s14 = smov %s518_s21 }
 0x185   : > { %s666_s15 = smov %s506_s18  ;;  %18 = sbr.rel (!%p16_p4) target bundleno = 5 (0x5), region = 77 }
 0x18c   :  { %247 = vsyncpa [#allocation3], 1 }
 0x18d   :  { %249 = vsyncpa [#allocation3 + $0x1], 1 }
 0x18e   :  { %250 = vsyncpa [#allocation4], 1 }
 0x18f   :  { %252 = vsyncpa [#allocation4 + $0x1], 1 }

</bundles_post_ra>
